<compile_context>
chip_gen: v7x
topology: tpu7x:2x2x1
jax: 0.10.0
libtpu: 0.0.40
codegen_flags: <defaults>
</compile_context>

<pallas_src>
import functools

import jax
import jax.numpy as jnp
from jax import lax
from jax.experimental import pallas as pl
from jax.experimental.pallas import tpu as pltpu


def _ce_label_smooth_kernel(x_ref, tgt_ref, out_ref, *,
                            epsilon, num_classes, batch, block_rows,
                            tiles_per_shard, needs_mask):
    i = pl.program_id(1)

    # Per-shard accumulator lives in the resident (1, 1) output block.
    @pl.when(i == 0)
    def _init():
        out_ref[...] = jnp.zeros_like(out_ref)

    x = x_ref[...].astype(jnp.float32)        # [TB, C]  logits tile (f32 compute)
    tgt = tgt_ref[...]                        # [TB, 1]  int32 labels

    tb, c = x.shape

    # Lane-dense log-sum-exp over the class axis.
    mx = jnp.max(x, axis=1, keepdims=True)                              # [TB, 1]
    lse = jnp.log(jnp.sum(jnp.exp(x - mx), axis=1, keepdims=True)) + mx

    # Fused weighted reduction: w = eps/C + (1-eps)*[class == target].
    # (1, C) iota broadcast against (TB, 1) targets -> no (TB, C) int temp.
    class_ids = lax.broadcasted_iota(jnp.int32, (1, c), 1)
    w = jnp.where(class_ids == tgt,
                  1.0 - epsilon + epsilon / num_classes,
                  epsilon / num_classes)                                # [TB, C]
    wsum = jnp.sum(w * x, axis=1, keepdims=True)                        # [TB, 1]

    row_loss = lse - wsum                                               # [TB, 1]

    if needs_mask:
        # Only pay for the validity mask when the padded grid overshoots B.
        s = pl.program_id(0)
        tile_idx = s * tiles_per_shard + i
        row_ids = tile_idx * block_rows + lax.broadcasted_iota(
            jnp.int32, (tb, 1), 0)
        row_loss = jnp.where(row_ids < batch, row_loss, 0.0)

    out_ref[...] += jnp.sum(row_loss, keepdims=True)                    # (1, 1)


def _vmem_capacity_bytes():
    try:
        info = pltpu.get_tpu_info()
        cap = getattr(info, "vmem_capacity_bytes", None)
        if cap:
            return int(cap)
    except Exception:
        pass
    return 64 << 20  # conservative fallback (v7x per-TC)


def cross_entropy_label_smooth(logits, target, *, num_classes, epsilon=0.1,
                               block_rows=None, num_shards=None):
    """Label-smoothed cross entropy; logits [B, C], target [B] int."""
    B, C = logits.shape
    assert C == num_classes, (C, num_classes)

    itemsize = jnp.dtype(logits.dtype).itemsize
    # Sublane packing: f32 -> 8, bf16 -> 16, int8/fp8 -> 32 rows per vreg.
    row_align = max(8, 32 // itemsize)
    vmem_cap = _vmem_capacity_bytes()

    if block_rows is None:
        # ~6 MiB of logits per pipeline buffer (amortizes the ~0.35us per-step
        # overhead), but never more than ~75% of physical VMEM once the
        # double-buffered input + in-kernel f32 temporaries are accounted for.
        rows_target = (6 << 20) // max(1, C * itemsize)
        rows_vmem = int(0.75 * vmem_cap) // max(1, C * (2 * itemsize + 12))
        block_rows = min(rows_target, rows_vmem)
        b_pad = pl.cdiv(B, row_align) * row_align
        block_rows = min(block_rows, b_pad)
        block_rows = max(row_align, (block_rows // row_align) * row_align)
    block_rows = int(block_rows)

    tiles_total = pl.cdiv(B, block_rows)
    if num_shards is None:
        # Outer 'parallel' axis: lets v7x use both TensorCores; harmless on
        # single-TC chips.
        num_shards = 2 if tiles_total >= 2 else 1
    num_shards = int(num_shards)
    tiles_per_shard = pl.cdiv(tiles_total, num_shards)

    needs_mask = (num_shards * tiles_per_shard * block_rows != B)

    tgt = target.astype(jnp.int32).reshape(B, 1)

    def logits_map(s, i):
        blk = s * tiles_per_shard + i
        # Clamp fully out-of-range tiles onto the last valid block; their rows
        # are zeroed by the validity mask inside the kernel.
        return (jnp.minimum(blk, tiles_total - 1), 0)

    kernel = functools.partial(
        _ce_label_smooth_kernel,
        epsilon=float(epsilon),
        num_classes=int(num_classes),
        batch=int(B),
        block_rows=block_rows,
        tiles_per_shard=int(tiles_per_shard),
        needs_mask=bool(needs_mask),
    )

    # Explicit VMEM budget: double-buffered logits + labels + f32 temporaries.
    est_bytes = (2 * block_rows * C * itemsize     # logits, double buffered
                 + 4 * block_rows * C * 4          # in-kernel f32 temporaries
                 + 4 * block_rows * 4              # labels, double buffered
                 + (2 << 20))                      # slack
    vmem_limit = int(min(vmem_cap, max(est_bytes, 32 << 20)))

    partial = pl.pallas_call(
        kernel,
        out_shape=jax.ShapeDtypeStruct((num_shards, 1), jnp.float32),
        grid=(num_shards, tiles_per_shard),
        in_specs=[
            pl.BlockSpec((block_rows, C), logits_map),   # logits tile
            pl.BlockSpec((block_rows, 1), logits_map),   # labels tile
        ],
        # Same (s, 0) block across the inner axis -> per-shard resident
        # accumulator.
        out_specs=pl.BlockSpec((1, 1), lambda s, i: (s, 0)),
        compiler_params=pltpu.CompilerParams(
            dimension_semantics=("parallel", "arbitrary"),
            vmem_limit_bytes=vmem_limit),
    )(logits, tgt)

    # Final cross-shard sum + mean over the batch (matches .mean(0).sum()).
    return jnp.sum(partial) / jnp.float32(B)


def _reference(logits, target, *, num_classes, epsilon=0.1):
    log_probs = jax.nn.log_softmax(logits.astype(jnp.float32), axis=1)
    onehot = jax.nn.one_hot(target, num_classes, dtype=jnp.float32)
    smooth = (1.0 - epsilon) * onehot + epsilon / num_classes
    return jnp.sum(jnp.mean(-smooth * log_probs, axis=0))


if __name__ == "__main__":
    epsilon = 0.1
    key = jax.random.PRNGKey(0)

    # Test 1: small f32 case, single tile.
    batch, num_classes = 8, 16
    k_logits, k_target, key = jax.random.split(key, 3)
    logits = jax.random.normal(k_logits, (batch, num_classes),
                               dtype=jnp.float32) * 3.0
    target = jax.random.randint(k_target, (batch,), 0, num_classes,
                                dtype=jnp.int32)
    loss = cross_entropy_label_smooth(
        logits, target, num_classes=num_classes, epsilon=epsilon)
    loss = jax.block_until_ready(loss)
    ref = _reference(logits, target, num_classes=num_classes, epsilon=epsilon)
    assert jnp.isfinite(loss), loss
    assert jnp.allclose(loss, ref, rtol=1e-5, atol=1e-5), (loss, ref)

    # Test 2: ragged batch, multiple tiles, 2 batch shards (exercises the
    # parallel shard axis, the resident per-shard accumulator and the
    # row-validity mask).
    batch2, num_classes2 = 50, 128
    k_logits, k_target, key = jax.random.split(key, 3)
    logits2 = jax.random.normal(k_logits, (batch2, num_classes2),
                                dtype=jnp.float32) * 2.0
    target2 = jax.random.randint(k_target, (batch2,), 0, num_classes2,
                                 dtype=jnp.int32)
    loss2 = cross_entropy_label_smooth(
        logits2, target2, num_classes=num_classes2, epsilon=epsilon,
        block_rows=16)
    loss2 = jax.block_until_ready(loss2)
    ref2 = _reference(logits2, target2, num_classes=num_classes2,
                      epsilon=epsilon)
    assert jnp.isfinite(loss2), loss2
    assert jnp.allclose(loss2, ref2, rtol=1e-5, atol=1e-5), (loss2, ref2)

    print("KERNEL_OK")
</pallas_src>

<mosaic_0001>
module attributes {stable_mosaic.version = 11 : i64} {
  func.func @_ce_label_smooth_kernel(%arg0: i32, %arg1: i32, %arg2: memref<8x16xf32, #tpu.memory_space<vmem>>, %arg3: memref<8x1xi32, #tpu.memory_space<vmem>>, %arg4: memref<1x1xf32, #tpu.memory_space<vmem>>) attributes {dimension_semantics = [#tpu.dimension_semantics<parallel>, #tpu.dimension_semantics<arbitrary>], iteration_bounds = array<i64: 1, 1>, scalar_prefetch = 0 : i64, scratch_operands = 0 : i64, tpu.core_type = #tpu.core_type<tc>, window_params = [{transform_indices = @transform_0, window_bounds = array<i64: 8, 16>}, {transform_indices = @transform_1, window_bounds = array<i64: 8, 1>}, {transform_indices = @transform_2, window_bounds = array<i64: 1, 1>}]} {
    %c0_i32 = arith.constant 0 : i32
    %0 = arith.cmpi eq, %arg1, %c0_i32 : i32
    %1 = arith.extui %0 : i1 to i32
    %c0_i32_0 = arith.constant 0 : i32
    %2 = arith.cmpi ne, %1, %c0_i32_0 : i32
    scf.if %2 {
      %cst_13 = arith.constant 0.000000e+00 : f32
      %33 = vector.broadcast %cst_13 : f32 to vector<1x1xf32>
      %c0_14 = arith.constant 0 : index
      %c0_15 = arith.constant 0 : index
      %34 = vector.load %arg4[%c0_14, %c0_15] : memref<1x1xf32, #tpu.memory_space<vmem>>, vector<1x1xf32>
      tpu.vector_store %arg4[%c0_14, %c0_15], %33 {strides = array<i32>} : memref<1x1xf32, #tpu.memory_space<vmem>>, vector<1x1xf32>,
    } else {
    }
    %c0 = arith.constant 0 : index
    %c0_1 = arith.constant 0 : index
    %3 = vector.load %arg2[%c0, %c0_1] : memref<8x16xf32, #tpu.memory_space<vmem>>, vector<8x16xf32>
    %c0_2 = arith.constant 0 : index
    %c0_3 = arith.constant 0 : index
    %4 = vector.load %arg3[%c0_2, %c0_3] : memref<8x1xi32, #tpu.memory_space<vmem>>, vector<8x1xi32>
    %cst = arith.constant dense<0xFF800000> : vector<8xf32>
    %5 = vector.multi_reduction <maximumf>, %3, %cst [1] : vector<8x16xf32> to vector<8xf32>
    %6 = vector.shape_cast %5 : vector<8xf32> to vector<8x1xf32>
    %7 = vector.broadcast %6 : vector<8x1xf32> to vector<8x16xf32>
    %8 = arith.subf %3, %7 : vector<8x16xf32>
    %9 = math.exp %8 : vector<8x16xf32>
    %cst_4 = arith.constant dense<0.000000e+00> : vector<8xf32>
    %10 = vector.multi_reduction <add>, %9, %cst_4 [1] : vector<8x16xf32> to vector<8xf32>
    %11 = vector.shape_cast %10 : vector<8xf32> to vector<8x1xf32>
    %12 = math.log %11 : vector<8x1xf32>
    %13 = arith.addf %12, %6 : vector<8x1xf32>
    %14 = tpu.iota {dimensions = array<i32: 1>} : vector<1x16xi32>
    %15 = vector.broadcast %14 : vector<1x16xi32> to vector<8x16xi32>
    %16 = vector.broadcast %4 : vector<8x1xi32> to vector<8x16xi32>
    %17 = arith.cmpi eq, %15, %16 : vector<8x16xi32>
    %cst_5 = arith.constant 9.062500e-01 : f32
    %cst_6 = arith.constant 6.250000e-03 : f32
    %18 = vector.broadcast %cst_5 : f32 to vector<8x16xf32>
    %19 = vector.broadcast %cst_6 : f32 to vector<8x16xf32>
    %20 = arith.select %17, %18, %19 : vector<8x16xi1>, vector<8x16xf32>
    %21 = arith.mulf %20, %3 : vector<8x16xf32>
    %cst_7 = arith.constant dense<0.000000e+00> : vector<8xf32>
    %22 = vector.multi_reduction <add>, %21, %cst_7 [1] : vector<8x16xf32> to vector<8xf32>
    %23 = vector.shape_cast %22 : vector<8xf32> to vector<8x1xf32>
    %24 = arith.subf %13, %23 : vector<8x1xf32>
    %c0_8 = arith.constant 0 : index
    %c0_9 = arith.constant 0 : index
    %25 = vector.load %arg4[%c0_8, %c0_9] : memref<1x1xf32, #tpu.memory_space<vmem>>, vector<1x1xf32>
    %26 = vector.shape_cast %24 : vector<8x1xf32> to vector<1x8x1xf32>
    %cst_10 = arith.constant dense<0.000000e+00> : vector<1xf32>
    %27 = vector.multi_reduction <add>, %26, %cst_10 [1, 2] : vector<1x8x1xf32> to vector<1xf32>
    %28 = vector.shape_cast %27 : vector<1xf32> to vector<1x1x1xf32>
    %29 = vector.extract %28[0, 0, 0] : f32 from vector<1x1x1xf32>
    %30 = vector.broadcast %29 : f32 to vector<1x1xf32>
    %31 = arith.addf %25, %30 : vector<1x1xf32>
    %c0_11 = arith.constant 0 : index
    %c0_12 = arith.constant 0 : index
    %32 = vector.load %arg4[%c0_11, %c0_12] : memref<1x1xf32, #tpu.memory_space<vmem>>, vector<1x1xf32>
    tpu.vector_store %arg4[%c0_11, %c0_12], %31 {strides = array<i32>} : memref<1x1xf32, #tpu.memory_space<vmem>>, vector<1x1xf32>,
    return
  }
  func.func @transform_0(%arg0: i32, %arg1: i32) -> (i32, i32) {
    %c1_i32 = arith.constant 1 : i32
    %0 = arith.muli %arg0, %c1_i32 : i32
    %1 = arith.addi %0, %arg1 : i32
    %c0_i32 = arith.constant 0 : i32
    %2 = arith.minsi %1, %c0_i32 : i32
    %c0_i32_0 = arith.constant 0 : i32
    %c0_i32_1 = arith.constant 0 : i32
    return %2, %c0_i32_0 : i32, i32
  }
  func.func @transform_1(%arg0: i32, %arg1: i32) -> (i32, i32) {
    %c1_i32 = arith.constant 1 : i32
    %0 = arith.muli %arg0, %c1_i32 : i32
    %1 = arith.addi %0, %arg1 : i32
    %c0_i32 = arith.constant 0 : i32
    %2 = arith.minsi %1, %c0_i32 : i32
    %c0_i32_0 = arith.constant 0 : i32
    %c0_i32_1 = arith.constant 0 : i32
    return %2, %c0_i32_0 : i32, i32
  }
  func.func @transform_2(%arg0: i32, %arg1: i32) -> (i32, i32) {
    %c0_i32 = arith.constant 0 : i32
    %c0_i32_0 = arith.constant 0 : i32
    return %arg0, %c0_i32 : i32, i32
  }
}

</mosaic_0001>

<bundles_post_ra>
// kernel: tpu_custom_call.1
= control target key start
LH: loop header
LB: loop body
LE: loop exit
PB: predicated region body
PF: predicated region fallthrough
CT: control target
= control target key end

     0   :  { %vm74_vm0 = vcmask 130048   ;;  %s218_s0 = inlined_call_operand.vmem [shape: f32[8,16], index: 0, kind: input, shape index: {}]   ;;  %s219_s1 = inlined_call_operand.vmem [shape: s32[8,1], index: 1, kind: input, shape index: {}]   ;;  %s220_s2 = inlined_call_operand.hbm [shape: f32[1,1], index: 2, kind: output, shape index: {}]  }
   0x1   :  { %v72_v0 = vld [vmem:[%s218_s0] sm:$0xff] }
   0x2   :  { %7 = vsyncpa [#allocation3], 0  ;;  %v75_v1 = vsel %vm74_vm0, %v72_v0, -inf  ;;  %v176_v2 = vmov 0   ;;  %v73_v3 = vld [vmem:[%s219_s1] sm:$0xff]  ;;  %v87_v6 = vlaneseq  ;;  %vm100_vm2 = vcmask 7168  }
   0x3   :  { %147 = vset.pattern.permute.xlu0 %v176_v2  ;;  %v177_v10 = vmov 0.00625   ;;  %vm70_vm3 = vcmask 0   ;;  %v178_v23 = vmov 0.0   ;;  %s179_s0 = smov [#allocation2]  }
   0x4   :  { %76 = vmax.xlane.f32.xlu0 %v75_v1  ;;  %v88_v8 = vand.u32 127, %v87_v6  ;;  %71 = vst.msk [vmem:[#allocation2] sm:$0x1] %vm70_vm3, %v178_v23  ;;  %s121_s1 = sshll.u32 %s179_s0, 4  ;;  %s122_s1 = int_to_ptr.vmem [resolvable:$true] %s121_s1 }
   0x5   :  { %s152_s14 = scalar_lea.vmem %s122_s1, 16  ;;  %s156_s15 = scalar_lea.vmem %s122_s1, 32 }
   0x6   :  { %p153_p0 = scmp.ne.s32.totalorder %s122_s1, %s152_s14  ;;  %p157_p1 = scmp.lt.s32.totalorder %s122_s1, %s122_s1 }
   0x7   :  { %p158_p2 = scmp.lt.s32.totalorder %s156_s15, %s152_s14 }
   0x9   :  { %p159_p3 = por %p158_p2, %p157_p1 }
   0xb   :  { %v99_v31 = vld [vmem:[#allocation2] sm:$0x1]  ;;  %p160_p4 = pnand %p159_p3, %p153_p0 }
  0x1a   :  { %90 = vperm.xlu0 %147, %v73_v3  }
  0x91   :  { %v77_v4 = vpop.xlane.xlu0 %76 }
  0x92   :  { %v78_v5 = vsub.f32 %v72_v0, %v77_v4 }
  0x94   :  { %v79_v7 = vmul.f32 1.442695, %v78_v5 }
  0x96   :  { %148 = vpow2.f32 %v79_v7 }
  0x99   :  { %v91_v9 = vpop.permute.xlu0 %90 }
  0x9a   :  { %vm92_vm1 = vcmp.eq.s32.totalorder %v88_v8, %v91_v9 }
  0x9b   :  { %v93_v11 = vsel %vm92_vm1, 0.90625, %v177_v10 }
  0x9c   :  { %v94_v12 = vmul.f32 %v93_v11, %v72_v0 }
  0x9e   :  { %v95_v15 = vsel %vm74_vm0, %v94_v12, 0.0 }
  0xa0   :  { %v149_v13 = vpop.eup %148 }
  0xa1   :  { %v81_v14 = vsel %vm74_vm0, %v149_v13, 0.0 }
  0xa2   :  { %82 = vadd.xlane.f32.xlu1 %v81_v14 }
  0xa6   :  { %96 = vadd.xlane.f32.xlu1 %v95_v15 }
 0x12f   :  { %v83_v16 = vpop.xlane.xlu1 %82 }
 0x130   :  { %150 = vlog2.f32 %v83_v16 }
 0x133   :  { %v97_v19 = vpop.xlane.xlu1 %96 }
 0x13a   :  { %v151_v17 = vpop.eup %150 }
 0x13b   :  { %v85_v18 = vmul.f32 0.6931472, %v151_v17 }
 0x13d   :  { %v86_v20 = vadd.f32 %v85_v18, %v77_v4 }
 0x13f   :  { %v98_v21 = vsub.f32 %v86_v20, %v97_v19 }
 0x141   :  { %v101_v22 = vsel %vm100_vm2, %v98_v21, 0.0 }
 0x142   :  { %102 = vadd.xlane.f32.xlu1 %v101_v22 }
 0x1cf   :  { %v103_v24 = vpop.xlane.xlu1 %102 }
 0x1d0   :  { %v104_v25 = vrot.slane %v103_v24, 4 }
 0x1d2   :  { %v105_v26 = vadd.f32 %v104_v25, %v103_v24 }
 0x1d4   :  { %v106_v27 = vrot.slane %v105_v26, 2 }
 0x1d6   :  { %v107_v28 = vadd.f32 %v106_v27, %v105_v26 }
 0x1d8   :  { %v108_v29 = vrot.slane %v107_v28, 1 }
 0x1da   :  { %v109_v30 = vadd.f32 %v108_v29, %v107_v28 }
 0x1dc   :  { %141 = vpush %v109_v30 }
 0x20d   :  { %s142_s13 = spop %141 }
 0x20e   :  { %v111_v32 = vstv %s142_s13 }
 0x20f   :  { %v112_v33 = vadd.f32 %v111_v32, %v99_v31 }
 0x211   :  { %114 = vst.msk [vmem:[#allocation2] sm:$0x1] %vm70_vm3, %v112_v33 }
 0x212   :  { %163 = shalt.err (!%p160_p4)
}
 0x213   :  { %s164_s18 = scalar_lea.hbm %s220_s2, 16 }
 0x214   :  { %p165_p5 = scmp.ne.s32.totalorder %s220_s2, %s164_s18  ;;  %p168_p6 = scmp.lt.u32.totalorder %s164_s18, %s220_s2 }
 0x216   :  { %p170_p7 = pnand %p168_p6, %p165_p5 }
 0x218   :  { %173 = shalt.err (!%p170_p7)
}
 0x219   :  { %124 = dma.vmem_to_hbm [thread:$0]  %s122_s1, 16, %s220_s2, [#allocation3]  }
 0x21a   :  { %174 = dma.done.wait [#allocation3], 16  }
 0x21b   :  { %175 = vsyncadd [#allocation3], 4294967280 }
 0x21c   :  { %128 = vsyncpa [#allocation3], 1 }

</bundles_post_ra>
